<compile_context>
chip_gen: v5e
topology: v5e:2x2
jax: 0.10.0
libtpu: 0.0.40
codegen_flags: <defaults>
</compile_context>

<pallas_src>
import jax
import jax.numpy as jnp
from jax.experimental import pallas as pl
from jax.experimental.pallas import tpu as pltpu

D_IN = 28 * 28          # 784 (full contraction dim, no padding needed)
H = 128                 # hidden
N_OUT = 10              # logits
N_PAD = 128             # lane-dense padded output width


def _round_up(v, m):
    return (v + m - 1) // m * m


def _choose_tile_b(B, tile_b_max):
    """Batch tile: big (amortize ~0.35 us/step), multiple of 8, and on v7x keep
    grid_b >= 2 (one tile per TensorCore) when that still leaves tiles >= 512 rows."""
    tile_b = min(tile_b_max, _round_up(B, 8))
    if _round_up(B, tile_b) // tile_b < 2:          # single grid step -> one TC idle on v7x
        half = _round_up((B + 1) // 2, 8)
        if half >= 512:
            tile_b = half
    return tile_b


def mlp_kernel(x_ref, w1_ref, b1_ref, w2_ref, b2_ref, o_ref):
    # f32 x tile -> bf16 on the VPU (hides under the x DMA; avoids a wrapper-side
    # second HBM copy of x).
    xb = x_ref[...].astype(jnp.bfloat16)
    # (TILE_B, 784) bf16 @ (784, 128) bf16 -> (TILE_B, 128) f32 on the MXU.
    h = jnp.dot(xb, w1_ref[...], preferred_element_type=jnp.float32)
    # f32 bias + ReLU epilogue on the VPU (safe on v5e: no bf16 VPU there).
    h = jnp.maximum(h + b1_ref[...], 0.0)
    # (TILE_B, 128) bf16 @ (128, 128) bf16 -> (TILE_B, 128) f32, lane-dense store.
    out = jnp.dot(h.astype(jnp.bfloat16), w2_ref[...],
                  preferred_element_type=jnp.float32)
    o_ref[...] = (out + b2_ref[...]).astype(o_ref.dtype)


def prepare_params(w1, b1, w2, b2):
    """One-time weight prep (hoisted out of the per-call path).

    Weights are stored (in, out), i.e. already transposed vs. nn.Linear.weight, so the
    kernel computes x @ W + b — the same math as PyTorch's x @ W.T + b.
    """
    w1_p = w1.astype(jnp.bfloat16)                                        # (784, 128)
    b1_p = b1.reshape(1, H).astype(jnp.float32)                           # (1, 128)
    w2_p = jnp.zeros((H, N_PAD), jnp.bfloat16).at[:, :N_OUT].set(
        w2.astype(jnp.bfloat16))                                          # (128, 128)
    b2_p = jnp.zeros((1, N_PAD), jnp.float32).at[:, :N_OUT].set(
        b2.astype(jnp.float32))                                           # (1, 128)
    return w1_p, b1_p, w2_p, b2_p


def simple_nn_forward(x, params, tile_b_max=1024):
    """x: (B, 1, 28, 28) float32 NCHW -> logits (B, 10) float32."""
    w1_p, b1_p, w2_p, b2_p = params

    B = x.shape[0]
    x_flat = x.reshape(B, D_IN).astype(jnp.float32)   # nn.Flatten() (glue)

    tile_b = _choose_tile_b(B, tile_b_max)
    B_pad = _round_up(B, tile_b)
    grid_b = B_pad // tile_b
    if B_pad != B:
        # Zero rows produce relu(b1)@w2 garbage, which the final [:B] slice discards.
        x_flat = jnp.pad(x_flat, ((0, B_pad - B), (0, 0)))

    flops = 2 * B_pad * (D_IN * H + H * N_PAD)
    bytes_accessed = (B_pad * D_IN * 4                 # x (f32, read once)
                      + w1_p.size * 2 + b1_p.size * 4  # weights/biases (read once)
                      + w2_p.size * 2 + b2_p.size * 4
                      + B_pad * N_PAD * 4)             # f32 logits writeback

    logits_pad = pl.pallas_call(
        mlp_kernel,
        out_shape=jax.ShapeDtypeStruct((B_pad, N_PAD), jnp.float32),
        grid=(grid_b,),
        in_specs=[
            pl.BlockSpec((tile_b, D_IN), lambda i: (i, 0)),   # x: tiled over batch
            pl.BlockSpec((D_IN, H), lambda i: (0, 0)),        # w1: VMEM-resident
            pl.BlockSpec((1, H), lambda i: (0, 0)),           # b1: VMEM-resident
            pl.BlockSpec((H, N_PAD), lambda i: (0, 0)),       # w2: VMEM-resident
            pl.BlockSpec((1, N_PAD), lambda i: (0, 0)),       # b2: VMEM-resident
        ],
        out_specs=pl.BlockSpec((tile_b, N_PAD), lambda i: (i, 0)),
        compiler_params=pltpu.CompilerParams(
            dimension_semantics=("parallel",),
            vmem_limit_bytes=32 * 1024 * 1024),
        cost_estimate=pl.CostEstimate(
            flops=flops, transcendentals=0, bytes_accessed=bytes_accessed),
    )(x_flat, w1_p, b1_p, w2_p, b2_p)

    return logits_pad[:B, :N_OUT]


if __name__ == "__main__":
    key = jax.random.PRNGKey(0)
    k_x, k_w1, k_b1, k_w2, k_b2 = jax.random.split(key, 5)

    B = 8
    # Deterministic synthetic parameters (shapes from nn.Linear(784,128), nn.Linear(128,10)),
    # stored as (in, out).
    w1 = jax.random.normal(k_w1, (D_IN, H), dtype=jnp.float32) * 0.02
    b1 = jax.random.normal(k_b1, (H,), dtype=jnp.float32) * 0.02
    w2 = jax.random.normal(k_w2, (H, N_OUT), dtype=jnp.float32) * 0.02
    b2 = jax.random.normal(k_b2, (N_OUT,), dtype=jnp.float32) * 0.02

    x = jax.random.normal(k_x, (B, 1, 28, 28), dtype=jnp.float32)

    params = prepare_params(w1, b1, w2, b2)   # one-time weight prep
    out = simple_nn_forward(x, params)
    jax.block_until_ready(out)
    assert out.shape == (B, N_OUT)

    # Reference mirroring the kernel's bf16-input / f32-accum precision.
    xb = x.reshape(B, -1).astype(jnp.bfloat16)
    h_ref = jnp.maximum(
        jnp.dot(xb, w1.astype(jnp.bfloat16), preferred_element_type=jnp.float32) + b1, 0.0)
    ref = jnp.dot(h_ref.astype(jnp.bfloat16), w2.astype(jnp.bfloat16),
                  preferred_element_type=jnp.float32) + b2
    assert jnp.allclose(out, ref, atol=1e-2, rtol=1e-2)

    # Sanity vs. the pure-f32 PyTorch-equivalent math (looser tol for bf16 weights/activations).
    ref_f32 = jnp.maximum(x.reshape(B, -1) @ w1 + b1, 0.0) @ w2 + b2
    assert jnp.allclose(out, ref_f32, atol=5e-2, rtol=5e-2)

    print("KERNEL_OK")
</pallas_src>

<mosaic_0001>
module attributes {stable_mosaic.version = 11 : i64} {
  func.func @mlp_kernel(%arg0: i32, %arg1: memref<8x784xf32, #tpu.memory_space<vmem>>, %arg2: memref<784x128xbf16, #tpu.memory_space<vmem>>, %arg3: memref<1x128xf32, #tpu.memory_space<vmem>>, %arg4: memref<128x128xbf16, #tpu.memory_space<vmem>>, %arg5: memref<1x128xf32, #tpu.memory_space<vmem>>, %arg6: memref<8x128xf32, #tpu.memory_space<vmem>>) attributes {dimension_semantics = [#tpu.dimension_semantics<parallel>], iteration_bounds = array<i64: 1>, scalar_prefetch = 0 : i64, scratch_operands = 0 : i64, tpu.core_type = #tpu.core_type<tc>, window_params = [{transform_indices = @transform_0, window_bounds = array<i64: 8, 784>}, {pipeline_mode = #tpu.pipeline_mode<synchronous>, transform_indices = @transform_1, window_bounds = array<i64: 784, 128>}, {pipeline_mode = #tpu.pipeline_mode<synchronous>, transform_indices = @transform_2, window_bounds = array<i64: 1, 128>}, {pipeline_mode = #tpu.pipeline_mode<synchronous>, transform_indices = @transform_3, window_bounds = array<i64: 128, 128>}, {pipeline_mode = #tpu.pipeline_mode<synchronous>, transform_indices = @transform_4, window_bounds = array<i64: 1, 128>}, {transform_indices = @transform_5, window_bounds = array<i64: 8, 128>}]} {
    %c0 = arith.constant 0 : index
    %c0_0 = arith.constant 0 : index
    %0 = vector.load %arg1[%c0, %c0_0] : memref<8x784xf32, #tpu.memory_space<vmem>>, vector<8x784xf32>
    %1 = arith.truncf %0 : vector<8x784xf32> to vector<8x784xbf16>
    %c0_1 = arith.constant 0 : index
    %c0_2 = arith.constant 0 : index
    %2 = vector.load %arg2[%c0_1, %c0_2] : memref<784x128xbf16, #tpu.memory_space<vmem>>, vector<784x128xbf16>
    %cst = arith.constant dense<0.000000e+00> : vector<8x128xf32>
    %3 = tpu.matmul %1, %2, %cst {dimension_numbers = #tpu.dot_dimension_numbers<[1], [0], [0], [1], [0, 0, 1, 1], [], []>} : vector<8x784xbf16>, vector<784x128xbf16>, vector<8x128xf32> -> vector<8x128xf32>
    %c0_3 = arith.constant 0 : index
    %c0_4 = arith.constant 0 : index
    %4 = vector.load %arg3[%c0_3, %c0_4] : memref<1x128xf32, #tpu.memory_space<vmem>>, vector<1x128xf32>
    %5 = vector.broadcast %4 : vector<1x128xf32> to vector<8x128xf32>
    %6 = arith.addf %3, %5 : vector<8x128xf32>
    %cst_5 = arith.constant 0.000000e+00 : f32
    %7 = vector.broadcast %cst_5 : f32 to vector<8x128xf32>
    %8 = arith.maximumf %6, %7 : vector<8x128xf32>
    %9 = arith.truncf %8 : vector<8x128xf32> to vector<8x128xbf16>
    %c0_6 = arith.constant 0 : index
    %c0_7 = arith.constant 0 : index
    %10 = vector.load %arg4[%c0_6, %c0_7] : memref<128x128xbf16, #tpu.memory_space<vmem>>, vector<128x128xbf16>
    %cst_8 = arith.constant dense<0.000000e+00> : vector<8x128xf32>
    %11 = tpu.matmul %9, %10, %cst_8 {dimension_numbers = #tpu.dot_dimension_numbers<[1], [0], [0], [1], [0, 0, 1, 1], [], []>} : vector<8x128xbf16>, vector<128x128xbf16>, vector<8x128xf32> -> vector<8x128xf32>
    %c0_9 = arith.constant 0 : index
    %c0_10 = arith.constant 0 : index
    %12 = vector.load %arg5[%c0_9, %c0_10] : memref<1x128xf32, #tpu.memory_space<vmem>>, vector<1x128xf32>
    %13 = vector.broadcast %12 : vector<1x128xf32> to vector<8x128xf32>
    %14 = arith.addf %11, %13 : vector<8x128xf32>
    %c0_11 = arith.constant 0 : index
    %c0_12 = arith.constant 0 : index
    %15 = vector.load %arg6[%c0_11, %c0_12] : memref<8x128xf32, #tpu.memory_space<vmem>>, vector<8x128xf32>
    tpu.vector_store %arg6[%c0_11, %c0_12], %14 {strides = array<i32>} : memref<8x128xf32, #tpu.memory_space<vmem>>, vector<8x128xf32>,
    return
  }
  func.func @transform_0(%arg0: i32) -> (i32, i32) {
    %c0_i32 = arith.constant 0 : i32
    %c0_i32_0 = arith.constant 0 : i32
    return %arg0, %c0_i32 : i32, i32
  }
  func.func @transform_1(%arg0: i32) -> (i32, i32) {
    %c0_i32 = arith.constant 0 : i32
    %c0_i32_0 = arith.constant 0 : i32
    %c0_i32_1 = arith.constant 0 : i32
    return %c0_i32, %c0_i32_0 : i32, i32
  }
  func.func @transform_2(%arg0: i32) -> (i32, i32) {
    %c0_i32 = arith.constant 0 : i32
    %c0_i32_0 = arith.constant 0 : i32
    %c0_i32_1 = arith.constant 0 : i32
    return %c0_i32, %c0_i32_0 : i32, i32
  }
  func.func @transform_3(%arg0: i32) -> (i32, i32) {
    %c0_i32 = arith.constant 0 : i32
    %c0_i32_0 = arith.constant 0 : i32
    %c0_i32_1 = arith.constant 0 : i32
    return %c0_i32, %c0_i32_0 : i32, i32
  }
  func.func @transform_4(%arg0: i32) -> (i32, i32) {
    %c0_i32 = arith.constant 0 : i32
    %c0_i32_0 = arith.constant 0 : i32
    %c0_i32_1 = arith.constant 0 : i32
    return %c0_i32, %c0_i32_0 : i32, i32
  }
  func.func @transform_5(%arg0: i32) -> (i32, i32) {
    %c0_i32 = arith.constant 0 : i32
    %c0_i32_0 = arith.constant 0 : i32
    return %arg0, %c0_i32 : i32, i32
  }
}

</mosaic_0001>

<bundles_post_ra>
// kernel: tpu_custom_call.1
= control target key start
LH: loop header
LB: loop body
LE: loop exit
PB: predicated region body
PF: predicated region fallthrough
CT: control target
= control target key end

     0   :  { %10 = vsyncpa [#allocation3], 0  ;;  %s1124_s0 = inlined_call_operand.hbm [shape: f32[8,784], index: 0, kind: input, shape index: {}]   ;;  %s1125_s1 = inlined_call_operand.hbm [shape: bf16[784,128], index: 1, kind: input, shape index: {}]   ;;  %s1126_s2 = inlined_call_operand.vmem [shape: f32[1,128], index: 2, kind: input, shape index: {}]   ;;  %s1127_s3 = inlined_call_operand.hbm [shape: bf16[128,128], index: 3, kind: input, shape index: {}]   ;;  %s1128_s4 = inlined_call_operand.vmem [shape: f32[1,128], index: 4, kind: input, shape index: {}]   ;;  %s1129_s5 = inlined_call_operand.hbm [shape: f32[8,128], index: 5, kind: output, shape index: {}]  }
   0x1   :  { %11 = vsyncpa [#allocation6], 0  ;;  %s28_s20 = sshll.u32 %s1125_s1, 4  ;;  %s29_s20 = int_to_ptr.hbm [resolvable:$true] %s28_s20 }
   0x2   :  { %12 = vsyncpa [#allocation4], 0  ;;  %s1070_s21 = smov [#allocation5]   ;;  %s18_s25 = sshll.u32 %s1124_s0, 4  ;;  %s19_s25 = int_to_ptr.hbm [resolvable:$true] %s18_s25 }
   0x3   :  { %s30_s22 = sshll.u32 %s1070_s21, 4  ;;  %s1071_s26 = smov 64   ;;  %s31_s22 = int_to_ptr.vmem [resolvable:$true] %s30_s22 }
   0x4   :  { %s1072_s27 = smov 4   ;;  %s1073_s28 = smov [#allocation2]  }
   0x5   :  { %36 = dma.hbm_to_vmem [thread:$0]  %s29_s20, 6272, %s31_s22, [#allocation6], %s1071_s26, %s1071_s26, %s1072_s27  }
   0x6   :  { %s20_s29 = sshll.u32 %s1073_s28, 4  ;;  %s43_s7 = sshll.u32 %s1127_s3, 4  ;;  %s21_s29 = int_to_ptr.vmem [resolvable:$true] %s20_s29  ;;  %s44_s7 = int_to_ptr.hbm [resolvable:$true] %s43_s7 }
   0x7   :  { %23 = dma.hbm_to_vmem [thread:$0]  %s19_s25, 896, %s21_s29, [#allocation3]  }
   0x8   :  { %s1074_s1 = smov [#allocation7]  }
   0x9   :  { %s45_s8 = sshll.u32 %s1074_s1, 4  ;;  %s46_s8 = int_to_ptr.vmem [resolvable:$true] %s45_s8 }
   0xa   :  { %51 = dma.hbm_to_vmem [thread:$0]  %s44_s7, 1024, %s46_s8, [#allocation6], %s1071_s26, %s1071_s26, %s1072_s27  }
   0xb   :  { %1064 = dma.done.wait [#allocation3], 896  }
   0xc   :  { %1065 = vsyncadd [#allocation3], 4294966400 }
   0xd   :  { %1066 = dma.done.wait [#allocation6], 7296  }
   0xe   :  { %1067 = vsyncadd [#allocation6], 4294960000  ;;  %v910_v0 = vld [vmem:[#allocation5 + $0x38] sm:$0xff]  ;;  %v909_v3 = vld [vmem:[#allocation5 + $0x30] sm:$0xff]  ;;  %vm477_vm0 = vcmask 130048   ;;  %s1075_s10 = smov [#allocation8]  }
   0xf   :  { %v918_v1 = vld [vmem:[#allocation5 + $0x78] sm:$0xff]  ;;  %481 = vmatpush.bf16.msra.mxu0 %v910_v0  ;;  %v917_v4 = vld [vmem:[#allocation5 + $0x70] sm:$0xff]  ;;  %v908_v8 = vld [vmem:[#allocation5 + $0x28] sm:$0xff]  ;;  %s661_s11 = sshll.u32 %s1075_s10, 4  ;;  %s663_s14 = sshll.u32 %s1129_s5, 4  ;;  %s662_s11 = int_to_ptr.vmem [resolvable:$true] %s661_s11  ;;  %s664_s14 = int_to_ptr.hbm [resolvable:$true] %s663_s14 }
  0x10   :  { %v926_v2 = vld [vmem:[#allocation5 + $0xb8] sm:$0xff]  ;;  %494 = vmatpush.bf16.msra.mxu1 %v918_v1  ;;  %v925_v5 = vld [vmem:[#allocation5 + $0xb0] sm:$0xff]  ;;  %v916_v9 = vld [vmem:[#allocation5 + $0x68] sm:$0xff] }
  0x11   :  { %507 = vmatpush.bf16.msra.mxu2 %v926_v2  ;;  %v934_v6 = vld [vmem:[#allocation5 + $0xf8] sm:$0xff]  ;;  %v933_v7 = vld [vmem:[#allocation5 + $0xf0] sm:$0xff]  ;;  %v924_v10 = vld [vmem:[#allocation5 + $0xa8] sm:$0xff] }
  0x12   :  { %520 = vmatpush.bf16.msra.mxu3 %v934_v6  ;;  %v932_v11 = vld [vmem:[#allocation5 + $0xe8] sm:$0xff]  ;;  %v907_v12 = vld [vmem:[#allocation5 + $0x20] sm:$0xff]  ;;  %v906_v16 = vld [vmem:[#allocation5 + $0x18] sm:$0xff] }
  0x13   :  { %482 = vmatpush.bf16.msra.mxu0 %v909_v3  ;;  %v915_v13 = vld [vmem:[#allocation5 + $0x60] sm:$0xff]  ;;  %v914_v17 = vld [vmem:[#allocation5 + $0x58] sm:$0xff]  ;;  %v905_v20 = vld [vmem:[#allocation5 + $0x10] sm:$0xff] }
  0x14   :  { %495 = vmatpush.bf16.msra.mxu1 %v917_v4  ;;  %v923_v14 = vld [vmem:[#allocation5 + $0xa0] sm:$0xff]  ;;  %v922_v18 = vld [vmem:[#allocation5 + $0x98] sm:$0xff]  ;;  %v913_v21 = vld [vmem:[#allocation5 + $0x50] sm:$0xff] }
  0x15   :  { %508 = vmatpush.bf16.msra.mxu2 %v925_v5  ;;  %v931_v15 = vld [vmem:[#allocation5 + $0xe0] sm:$0xff]  ;;  %v930_v19 = vld [vmem:[#allocation5 + $0xd8] sm:$0xff]  ;;  %v921_v22 = vld [vmem:[#allocation5 + $0x90] sm:$0xff] }
  0x16   :  { %521 = vmatpush.bf16.msra.mxu3 %v933_v7  ;;  %v929_v23 = vld [vmem:[#allocation5 + $0xd0] sm:$0xff]  ;;  %v904_v24 = vld [vmem:[#allocation5 + $0x8] sm:$0xff]  ;;  %v903_v27 = vld [vmem:[#allocation5] sm:$0xff] }
  0x17   :  { %483 = vmatpush.bf16.msra.mxu0 %v908_v8  ;;  %v912_v25 = vld [vmem:[#allocation5 + $0x48] sm:$0xff]  ;;  %v911_v29 = vld [vmem:[#allocation5 + $0x40] sm:$0xff]  ;;  %v68_v31 = vld [vmem:[#allocation2 + $0x8] sm:$0xff] }
  0x18   :  { %496 = vmatpush.bf16.msra.mxu1 %v916_v9  ;;  %v920_v26 = vld [vmem:[#allocation5 + $0x88] sm:$0xff]  ;;  %v942_v32 = vld [vmem:[#allocation5 + $0x138] sm:$0xff]  ;;  %v919_v34 = vld [vmem:[#allocation5 + $0x80] sm:$0xff]  ;;  %v75_v37 = vpack.c.bf16 %v68_v31, %v68_v31 }
  0x19   :  { %509 = vmatpush.bf16.msra.mxu2 %v924_v10  ;;  %v928_v28 = vld [vmem:[#allocation5 + $0xc8] sm:$0xff]  ;;  %v950_v33 = vld [vmem:[#allocation5 + $0x178] sm:$0xff]  ;;  %v927_v38 = vld [vmem:[#allocation5 + $0xc0] sm:$0xff] }
  0x1a   :  { %522 = vmatpush.bf16.msra.mxu3 %v932_v11  ;;  %v67_v30 = vld [vmem:[#allocation2] sm:$0xff]  ;;  %v69_v35 = vld [vmem:[#allocation2 + $0x10] sm:$0xff]  ;;  %v951_v39 = vld [vmem:[#allocation5 + $0x180] sm:$0xff] }
  0x1b   :  { %484 = vmatpush.bf16.msra.mxu0 %v907_v12  ;;  %v74_v36 = vpack.c.bf16 %v67_v30, %v67_v30  ;;  %v70_v40 = vld [vmem:[#allocation2 + $0x18] sm:$0xff]  ;;  %v941_v41 = vld [vmem:[#allocation5 + $0x130] sm:$0xff]  ;;  %v76_v43 = vpack.c.bf16 %v69_v35, %v69_v35  ;;  %v940_v45 = vld [vmem:[#allocation5 + $0x128] sm:$0xff] }
  0x1c   :  { %497 = vmatpush.bf16.msra.mxu1 %v915_v13  ;;  %v949_v42 = vld [vmem:[#allocation5 + $0x170] sm:$0xff]  ;;  %v77_v44 = vpack.c.bf16 %v70_v40, %v70_v40  ;;  %v948_v46 = vld [vmem:[#allocation5 + $0x168] sm:$0xff]  ;;  %v939_v47 = vld [vmem:[#allocation5 + $0x120] sm:$0xff] }
  0x1d   :  { %510 = vmatpush.bf16.msra.mxu2 %v923_v14  ;;  %v947_v48 = vld [vmem:[#allocation5 + $0x160] sm:$0xff]  ;;  %v938_v49 = vld [vmem:[#allocation5 + $0x118] sm:$0xff]  ;;  %v937_v52 = vld [vmem:[#allocation5 + $0x110] sm:$0xff] }
  0x1e   :  { %523 = vmatpush.bf16.msra.mxu3 %v931_v15  ;;  %v946_v50 = vld [vmem:[#allocation5 + $0x158] sm:$0xff]  ;;  %v945_v53 = vld [vmem:[#allocation5 + $0x150] sm:$0xff]  ;;  %v936_v55 = vld [vmem:[#allocation5 + $0x108] sm:$0xff] }
  0x1f   :  { %485 = vmatpush.bf16.msra.mxu0 %v906_v16  ;;  %v73_v51 = vld [vmem:[#allocation2 + $0x30] sm:$0xff]  ;;  %v944_v56 = vld [vmem:[#allocation5 + $0x148] sm:$0xff]  ;;  %v935_v57 = vld [vmem:[#allocation5 + $0x100] sm:$0xff] }
  0x20   :  { %498 = vmatpush.bf16.msra.mxu1 %v914_v17  ;;  %v80_v54 = vpack.c.bf16 %v73_v51, %v73_v51  ;;  %v943_v58 = vld [vmem:[#allocation5 + $0x140] sm:$0xff]  ;;  %v71_v59 = vld [vmem:[#allocation2 + $0x20] sm:$0xff]  ;;  %v72_v60 = vld [vmem:[#allocation2 + $0x28] sm:$0xff] }
  0x21   :  { %511 = vmatpush.bf16.msra.mxu2 %v922_v18  ;;  %v78_v61 = vpack.c.bf16 %v71_v59, %v71_v59  ;;  %v79_v62 = vpack.c.bf16 %v72_v60, %v72_v60  ;;  %v959_v63 = vld [vmem:[#allocation7 + $0x38] sm:$0xff]  ;;  %v958_v0 = vld [vmem:[#allocation7 + $0x30] sm:$0xff]  ;;  %v957_v1 = vld [vmem:[#allocation7 + $0x28] sm:$0xff] }
  0x22   :  { %524 = vmatpush.bf16.msra.mxu3 %v930_v19  ;;  %v956_v2 = vld [vmem:[#allocation7 + $0x20] sm:$0xff]  ;;  %v955_v3 = vld [vmem:[#allocation7 + $0x18] sm:$0xff]  ;;  %v954_v4 = vld [vmem:[#allocation7 + $0x10] sm:$0xff] }
  0x23   :  { %486 = vmatpush.bf16.msra.mxu0 %v905_v20  ;;  %v953_v5 = vld [vmem:[#allocation7 + $0x8] sm:$0xff]  ;;  %v952_v8 = vld [vmem:[#allocation7] sm:$0xff] }
  0x24   :  { %499 = vmatpush.bf16.msra.mxu1 %v913_v21  ;;  %v966_v13 = vld [vmem:[%s1126_s2] ss:$0 sm:$0xff] }
  0x25   :  { %512 = vmatpush.bf16.msra.mxu2 %v921_v22  ;;  %v967_v31 = vld [vmem:[%s1128_s4] ss:$0 sm:$0xff] }
  0x26   :  { %525 = vmatpush.bf16.msra.mxu3 %v929_v23 }
  0x27   :  { %487 = vmatpush.bf16.msra.mxu0 %v904_v24 }
  0x28   :  { %500 = vmatpush.bf16.msra.mxu1 %v912_v25 }
  0x29   :  { %513 = vmatpush.bf16.msra.mxu2 %v920_v26 }
  0x2a   :  { %526 = vmatpush.bf16.msra.mxu3 %v928_v28 }
  0x2b   :  { %488 = vmatpush.bf16.msra.mxu0 %v903_v27 }
  0x2c   :  { %501 = vmatpush.bf16.msra.mxu1 %v911_v29 }
  0x2d   :  { %514 = vmatpush.bf16.msra.mxu2 %v919_v34 }
  0x2e   :  { %489 = vmatmul.bf16.vlgmr.msra.gmra.mxu0 %v74_v36  ;;  %527 = vmatpush.bf16.msra.mxu3 %v927_v38 }
  0x2f   :  { %533 = vmatpush.bf16.msrb.mxu0 %v942_v32  ;;  %502 = vmatmul.bf16.vlgmr.msra.gmra.mxu1 %v75_v37 }
  0x30   :  { %546 = vmatpush.bf16.msrb.mxu1 %v950_v33  ;;  %515 = vmatmul.bf16.vlgmr.msra.gmra.mxu2 %v76_v43 }
  0x31   :  { %566 = vmatpush.bf16.msrb.mxu2 %v951_v39  ;;  %528 = vmatmul.bf16.vlgmr.msra.gmra.mxu3 %v77_v44 }
  0x32   :  { %642 = vmatpush.bf16.msrb.mxu3 %v959_v63 }
  0x33   :  { %534 = vmatpush.bf16.msrb.mxu0 %v941_v41 }
  0x34   :  { %547 = vmatpush.bf16.msrb.mxu1 %v949_v42 }
  0x36   :  { %643 = vmatpush.bf16.msrb.mxu3 %v958_v0 }
  0x37   :  { %535 = vmatpush.bf16.msrb.mxu0 %v940_v45 }
  0x38   :  { %548 = vmatpush.bf16.msrb.mxu1 %v948_v46 }
  0x3a   :  { %644 = vmatpush.bf16.msrb.mxu3 %v957_v1 }
  0x3b   :  { %536 = vmatpush.bf16.msrb.mxu0 %v939_v47 }
  0x3c   :  { %549 = vmatpush.bf16.msrb.mxu1 %v947_v48 }
  0x3e   :  { %645 = vmatpush.bf16.msrb.mxu3 %v956_v2 }
  0x3f   :  { %537 = vmatpush.bf16.msrb.mxu0 %v938_v49 }
  0x40   :  { %550 = vmatpush.bf16.msrb.mxu1 %v946_v50  ;;  %870 = vmatmul.msk.bf16.vlgmr.msrb.gmra.mxu2 %vm477_vm0, %v80_v54 }
  0x42   :  { %646 = vmatpush.bf16.msrb.mxu3 %v955_v3 }
  0x43   :  { %538 = vmatpush.bf16.msrb.mxu0 %v937_v52 }
  0x44   :  { %551 = vmatpush.bf16.msrb.mxu1 %v945_v53 }
  0x46   :  { %647 = vmatpush.bf16.msrb.mxu3 %v954_v4 }
  0x47   :  { %539 = vmatpush.bf16.msrb.mxu0 %v936_v55 }
  0x48   :  { %552 = vmatpush.bf16.msrb.mxu1 %v944_v56 }
  0x4a   :  { %648 = vmatpush.bf16.msrb.mxu3 %v953_v5 }
  0x4b   :  { %540 = vmatpush.bf16.msrb.mxu0 %v935_v57 }
  0x4c   :  { %553 = vmatpush.bf16.msrb.mxu1 %v943_v58 }
  0x4e   :  { %541 = vmatmul.bf16.vlgmr.msrb.gmra.mxu0 %v78_v61  ;;  %649 = vmatpush.bf16.msrb.mxu3 %v952_v8 }
  0x4f   :  { %554 = vmatmul.bf16.vlgmr.msrb.gmra.mxu1 %v79_v62 }
  0xab   :  { %v490_v6 = vpop.f32.mrf.mxu0 }
  0xac   :  { %v503_v7 = vpop.f32.mrf.mxu1  ;;  %v491_v14 = vadd.f32 %v966_v13, %v490_v6 }
  0xae   :  { %v504_v17 = vadd.f32 %v503_v7, %v491_v14 }
  0xb3   :  { %v492_v9 = vpop.f32.mrf.mxu0  ;;  %v516_v11 = vpop.f32.mrf.mxu2 }
  0xb4   :  { %v505_v10 = vpop.f32.mrf.mxu1  ;;  %v529_v12 = vpop.f32.mrf.mxu3  ;;  %v517_v18 = vadd.f32 %v516_v11, %v504_v17 }
  0xb6   :  { %v530_v20 = vadd.f32 %v529_v12, %v517_v18 }
  0xbb   :  { %v518_v15 = vpop.f32.mrf.mxu2 }
  0xbc   :  { %v531_v16 = vpop.f32.mrf.mxu3 }
  0xc3   :  { %v568_v19 = vpop.f32.mrf.mxu2 }
  0xcb   :  { %v542_v21 = vpop.f32.mrf.mxu0  ;;  %v570_v25 = vpop.f32.mrf.mxu2 }
  0xcc   :  { %v555_v22 = vpop.f32.mrf.mxu1  ;;  %v543_v23 = vadd.f32 %v542_v21, %v530_v20 }
  0xce   :  { %v556_v24 = vadd.f32 %v555_v22, %v543_v23 }
  0xd0   :  { %v569_v26 = vadd.f32 %v568_v19, %v556_v24 }
  0xd2   :  { %v572_v27 = vmax.f32 %v569_v26, 0.0 }
  0xd3   :  { %v544_v28 = vpop.f32.mrf.mxu0 }
  0xd4   :  { %v557_v29 = vpop.f32.mrf.mxu1  ;;  %v573_v30 = vpack.c.bf16 %v572_v27, %v572_v27 }
  0xd6   :  { %650 = vmatmul.bf16.vlgmr.msrb.gmra.mxu3 %v573_v30 }
 0x159   :  { %v651_v32 = vpop.f32.mrf.mxu3 }
 0x15a   :  { %v652_v33 = vadd.f32 %v967_v31, %v651_v32 }
 0x15c   :  { %655 = vst [vmem:[#allocation8] sm:$0xff] %v652_v33 }
 0x15d   :  { %666 = dma.vmem_to_hbm [thread:$0]  %s662_s11, 128, %s664_s14, [#allocation4]  }
 0x161   :  { %v653_v34 = vpop.f32.mrf.mxu3 }
 0x162   :  { %1068 = dma.done.wait [#allocation4], 128  }
 0x163   :  { %1069 = vsyncadd [#allocation4], 4294967168 }
 0x164   :  { %671 = vsyncpa [#allocation3], 1 }
 0x165   :  { %672 = vsyncpa [#allocation6], 1 }
 0x166   :  { %673 = vsyncpa [#allocation4], 1 }

</bundles_post_ra>
